<compile_context>
chip_gen: v5e
topology: v5e:2x2
jax: 0.10.0
libtpu: 0.0.40
codegen_flags: <defaults>
</compile_context>

<pallas_src>
import jax
import jax.numpy as jnp
from jax.experimental import pallas as pl
from jax.experimental.pallas import tpu as pltpu

EPS = 1e-12
POWER_ITERATIONS = 1


def _round_up(x, m):
    return (x + m - 1) // m * m


# ----------------------------------------------------------------------------
# Kernel 1: power iteration -> inv_sigma (1,1) + updated u (1, Cout)
# ----------------------------------------------------------------------------
def _sigma_kernel(w_ref, u_ref, inv_sig_ref, u_out_ref):
    w = w_ref[...]                       # (Cout, Kp) f32, zero-padded columns
    u = u_ref[...]                       # (1, Cout)  f32
    wv = jnp.zeros_like(u)
    for _ in range(POWER_ITERATIONS):
        # v = l2normalize(W^T u)  (row form, MXU)
        v = jnp.dot(u, w, preferred_element_type=jnp.float32)           # (1, Kp)
        v = v * (1.0 / (jnp.sqrt(jnp.sum(v * v, keepdims=True)) + EPS))
        # u = l2normalize(W v)    (row form: (W v)^T = v @ W^T, MXU)
        wv = jax.lax.dot_general(
            v, w, (((1,), (1,)), ((), ())),
            preferred_element_type=jnp.float32)                          # (1, Cout)
        u = wv * (1.0 / (jnp.sqrt(jnp.sum(wv * wv, keepdims=True)) + EPS))
    sigma = jnp.sum(u * wv, keepdims=True)                                # (1, 1)
    inv_sig_ref[...] = 1.0 / sigma
    u_out_ref[...] = u


def power_iteration_inv_sigma(w2d_padded, u):
    Cout, Kp = w2d_padded.shape
    return pl.pallas_call(
        _sigma_kernel,
        out_shape=(
            jax.ShapeDtypeStruct((1, 1), jnp.float32),       # inv_sigma
            jax.ShapeDtypeStruct((1, Cout), jnp.float32),    # updated u
        ),
        in_specs=[
            pl.BlockSpec((Cout, Kp), lambda: (0, 0)),
            pl.BlockSpec((1, Cout), lambda: (0, 0)),
        ],
        out_specs=(
            pl.BlockSpec((1, 1), lambda: (0, 0)),
            pl.BlockSpec((1, Cout), lambda: (0, 0)),
        ),
    )(w2d_padded, u.reshape(1, Cout))


# ----------------------------------------------------------------------------
# Kernel 2: tiled conv-as-matmul in (Cout, M) layout, fused 1/sigma + bias
# ----------------------------------------------------------------------------
def _conv_matmul_kernel(inv_sig_ref, w_ref, b_ref, p_ref, o_ref, acc_ref):
    k = pl.program_id(1)

    @pl.when(k == 0)
    def _():
        acc_ref[...] = jnp.zeros_like(acc_ref)

    acc_ref[...] += jnp.dot(w_ref[...], p_ref[...],
                            preferred_element_type=jnp.float32)

    @pl.when(k == pl.num_programs(1) - 1)
    def _():
        inv_sigma = inv_sig_ref[0, 0]                      # SMEM scalar
        o_ref[...] = (acc_ref[...] * inv_sigma + b_ref[...]).astype(o_ref.dtype)


def conv_matmul_scaled(inv_sigma, w2d_padded, bias, patches_padded):
    Cout, Kp = w2d_padded.shape
    _, M = patches_padded.shape

    # Lane-dense tiles (multiples of 128); sized well under 32 MiB scoped VMEM
    # so they are safe on v5e/v6e/v7x alike.
    tm = 256 if M % 256 == 0 else (128 if M % 128 == 0 else M)
    tk = 512 if Kp % 512 == 0 else (256 if Kp % 256 == 0 else 128)
    grid = (M // tm, Kp // tk)

    return pl.pallas_call(
        _conv_matmul_kernel,
        out_shape=jax.ShapeDtypeStruct((Cout, M), jnp.float32),
        grid=grid,
        in_specs=[
            pl.BlockSpec(memory_space=pltpu.MemorySpace.SMEM),   # inv_sigma (1,1)
            pl.BlockSpec((Cout, tk), lambda i, k: (0, k)),       # weight (Cout, Kp)
            pl.BlockSpec((Cout, 1), lambda i, k: (0, 0)),        # bias   (Cout, 1)
            pl.BlockSpec((tk, tm), lambda i, k: (k, i)),         # patches (Kp, M)
        ],
        out_specs=pl.BlockSpec((Cout, tm), lambda i, k: (0, i)),
        scratch_shapes=[pltpu.VMEM((Cout, tm), jnp.float32)],
        compiler_params=pltpu.CompilerParams(
            dimension_semantics=("parallel", "arbitrary"),
            vmem_limit_bytes=32 * 1024 * 1024,
        ),
    )(inv_sigma, w2d_padded, bias.reshape(Cout, 1), patches_padded)


# ----------------------------------------------------------------------------
# Glue: im2col (plain JAX) + full forward
# ----------------------------------------------------------------------------
def _im2col_3x3_pad1_km(x):
    # x: (N, C, H, W) -> (C*9, N*H*W); row ordering (c, kh, kw) matches
    # weight.reshape(Cout, -1); column ordering (n, h, w) matches the output.
    # TODO(synk): fuse im2col into the matmul kernel (halo'd manual DMA of the
    # input) to avoid materializing the 9x-inflated patches array in HBM.
    N, C, H, W = x.shape
    xp = jnp.pad(x, ((0, 0), (0, 0), (1, 1), (1, 1)))
    cols = [xp[:, :, kh:kh + H, kw:kw + W] for kh in range(3) for kw in range(3)]
    p = jnp.stack(cols, axis=2)                 # (N, C, 9, H, W)
    p = jnp.transpose(p, (1, 2, 0, 3, 4))       # (C, 9, N, H, W)
    return p.reshape(C * 9, N * H * W)


@jax.jit
def spectral_norm_conv_forward(x, w_bar, bias, u):
    # x: (N,C,H,W) NCHW like PyTorch; w_bar: (Cout,C,3,3); bias: (Cout,); u: (Cout,)
    N, C, H, W = x.shape
    Cout = w_bar.shape[0]
    K = C * w_bar.shape[2] * w_bar.shape[3]
    Kp = _round_up(K, 128)
    M = N * H * W

    # Weight stays (Cout, K); zero-pad the contraction dim to lane-dense Kp.
    w2d_p = jnp.pad(w_bar.reshape(Cout, K), ((0, 0), (0, Kp - K)))

    inv_sigma, u_new = power_iteration_inv_sigma(w2d_p, u)          # kernel 1

    patches = _im2col_3x3_pad1_km(x)                                 # (K, M)
    patches_p = jnp.pad(patches, ((0, Kp - K), (0, 0)))              # (Kp, M)

    out2d = conv_matmul_scaled(inv_sigma, w2d_p, bias, patches_p)    # kernel 2: (Cout, M)

    out = out2d.reshape(Cout, N, H, W).transpose(1, 0, 2, 3)         # -> NCHW
    return out, u_new.reshape(Cout)


# ----------------------------------------------------------------------------
# Pure-JAX reference (mirrors the PyTorch semantics, incl. Conv2d bias)
# ----------------------------------------------------------------------------
def _reference_forward(x, w_bar, bias, u):
    Cout = w_bar.shape[0]
    w2d = w_bar.reshape(Cout, -1)
    v = None
    for _ in range(POWER_ITERATIONS):
        v = w2d.T @ u
        v = v / (jnp.linalg.norm(v) + EPS)
        wu = w2d @ v
        u = wu / (jnp.linalg.norm(wu) + EPS)
    sigma = u @ (w2d @ v)
    w_norm = w_bar / sigma
    out = jax.lax.conv_general_dilated(
        x, w_norm, window_strides=(1, 1), padding=((1, 1), (1, 1)),
        dimension_numbers=("NCHW", "OIHW", "NCHW"))
    return out + bias.reshape(1, Cout, 1, 1), u


if __name__ == "__main__":
    key = jax.random.PRNGKey(0)
    k_w, k_b, k_u, k_x = jax.random.split(key, 4)

    # module = nn.Conv2d(in_channels=4, out_channels=8, kernel_size=3, padding=1)
    N, C, H, W = 2, 4, 16, 16
    Cout = 8

    w_bar = jax.random.normal(k_w, (Cout, C, 3, 3), dtype=jnp.float32) * 0.1
    bias = jax.random.normal(k_b, (Cout,), dtype=jnp.float32) * 0.1
    u0 = jax.random.normal(k_u, (Cout,), dtype=jnp.float32)
    u0 = u0 / (jnp.linalg.norm(u0) + EPS)     # l2normalize at init (_make_params)
    x = jax.random.normal(k_x, (N, C, H, W), dtype=jnp.float32)

    out, u_new = spectral_norm_conv_forward(x, w_bar, bias, u0)
    out = jax.block_until_ready(out)
    u_new = jax.block_until_ready(u_new)

    ref_out, ref_u = _reference_forward(x, w_bar, bias, u0)
    ref_out = jax.block_until_ready(ref_out)

    assert out.shape == (N, Cout, H, W)
    assert jnp.allclose(out, ref_out, atol=1e-4, rtol=1e-4), "output mismatch vs reference"
    assert jnp.allclose(u_new, ref_u, atol=1e-4, rtol=1e-4), "u mismatch vs reference"

    print("KERNEL_OK")
</pallas_src>

<mosaic_0001>
module attributes {stable_mosaic.version = 11 : i64} {
  func.func @_sigma_kernel(%arg0: memref<8x128xf32, #tpu.memory_space<vmem>>, %arg1: memref<1x8xf32, #tpu.memory_space<vmem>>, %arg2: memref<1x1xf32, #tpu.memory_space<vmem>>, %arg3: memref<1x8xf32, #tpu.memory_space<vmem>>) attributes {dimension_semantics = [], scalar_prefetch = 0 : i64, scratch_operands = 0 : i64, tpu.core_type = #tpu.core_type<tc>} {
    %c0 = arith.constant 0 : index
    %c0_0 = arith.constant 0 : index
    %0 = vector.load %arg0[%c0, %c0_0] : memref<8x128xf32, #tpu.memory_space<vmem>>, vector<8x128xf32>
    %c0_1 = arith.constant 0 : index
    %c0_2 = arith.constant 0 : index
    %1 = vector.load %arg1[%c0_1, %c0_2] : memref<1x8xf32, #tpu.memory_space<vmem>>, vector<1x8xf32>
    %cst = arith.constant dense<0.000000e+00> : vector<1x128xf32>
    %2 = tpu.matmul %1, %0, %cst {dimension_numbers = #tpu.dot_dimension_numbers<[1], [0], [0], [1], [0, 0, 1, 1], [], []>} : vector<1x8xf32>, vector<8x128xf32>, vector<1x128xf32> -> vector<1x128xf32>
    %3 = arith.mulf %2, %2 : vector<1x128xf32>
    %4 = vector.shape_cast %3 : vector<1x128xf32> to vector<1x1x128xf32>
    %cst_3 = arith.constant dense<0.000000e+00> : vector<1xf32>
    %5 = vector.multi_reduction <add>, %4, %cst_3 [1, 2] : vector<1x1x128xf32> to vector<1xf32>
    %6 = vector.shape_cast %5 : vector<1xf32> to vector<1x1x1xf32>
    %7 = vector.extract %6[0, 0, 0] : f32 from vector<1x1x1xf32>
    %8 = vector.broadcast %7 : f32 to vector<1x1xf32>
    %9 = math.sqrt %8 : vector<1x1xf32>
    %cst_4 = arith.constant 9.99999996E-13 : f32
    %10 = vector.broadcast %cst_4 : f32 to vector<1x1xf32>
    %11 = arith.addf %9, %10 : vector<1x1xf32>
    %cst_5 = arith.constant 1.000000e+00 : f32
    %12 = vector.broadcast %cst_5 : f32 to vector<1x1xf32>
    %13 = arith.divf %12, %11 : vector<1x1xf32>
    %14 = vector.broadcast %13 : vector<1x1xf32> to vector<1x128xf32>
    %15 = arith.mulf %2, %14 : vector<1x128xf32>
    %cst_6 = arith.constant dense<0.000000e+00> : vector<1x8xf32>
    %16 = tpu.matmul %15, %0, %cst_6 {dimension_numbers = #tpu.dot_dimension_numbers<[1], [1], [0], [0], [0, 0, 1, 0], [], []>} : vector<1x128xf32>, vector<8x128xf32>, vector<1x8xf32> -> vector<1x8xf32>
    %17 = arith.mulf %16, %16 : vector<1x8xf32>
    %18 = vector.shape_cast %17 : vector<1x8xf32> to vector<1x1x8xf32>
    %cst_7 = arith.constant dense<0.000000e+00> : vector<1xf32>
    %19 = vector.multi_reduction <add>, %18, %cst_7 [1, 2] : vector<1x1x8xf32> to vector<1xf32>
    %20 = vector.shape_cast %19 : vector<1xf32> to vector<1x1x1xf32>
    %21 = vector.extract %20[0, 0, 0] : f32 from vector<1x1x1xf32>
    %22 = vector.broadcast %21 : f32 to vector<1x1xf32>
    %23 = math.sqrt %22 : vector<1x1xf32>
    %cst_8 = arith.constant 9.99999996E-13 : f32
    %24 = vector.broadcast %cst_8 : f32 to vector<1x1xf32>
    %25 = arith.addf %23, %24 : vector<1x1xf32>
    %cst_9 = arith.constant 1.000000e+00 : f32
    %26 = vector.broadcast %cst_9 : f32 to vector<1x1xf32>
    %27 = arith.divf %26, %25 : vector<1x1xf32>
    %28 = vector.broadcast %27 : vector<1x1xf32> to vector<1x8xf32>
    %29 = arith.mulf %16, %28 : vector<1x8xf32>
    %30 = arith.mulf %29, %16 : vector<1x8xf32>
    %31 = vector.shape_cast %30 : vector<1x8xf32> to vector<1x1x8xf32>
    %cst_10 = arith.constant dense<0.000000e+00> : vector<1xf32>
    %32 = vector.multi_reduction <add>, %31, %cst_10 [1, 2] : vector<1x1x8xf32> to vector<1xf32>
    %33 = vector.shape_cast %32 : vector<1xf32> to vector<1x1x1xf32>
    %34 = vector.extract %33[0, 0, 0] : f32 from vector<1x1x1xf32>
    %35 = vector.broadcast %34 : f32 to vector<1x1xf32>
    %cst_11 = arith.constant 1.000000e+00 : f32
    %36 = vector.broadcast %cst_11 : f32 to vector<1x1xf32>
    %37 = arith.divf %36, %35 : vector<1x1xf32>
    %c0_12 = arith.constant 0 : index
    %c0_13 = arith.constant 0 : index
    %38 = vector.load %arg2[%c0_12, %c0_13] : memref<1x1xf32, #tpu.memory_space<vmem>>, vector<1x1xf32>
    tpu.vector_store %arg2[%c0_12, %c0_13], %37 {strides = array<i32>} : memref<1x1xf32, #tpu.memory_space<vmem>>, vector<1x1xf32>,
    %c0_14 = arith.constant 0 : index
    %c0_15 = arith.constant 0 : index
    %39 = vector.load %arg3[%c0_14, %c0_15] : memref<1x8xf32, #tpu.memory_space<vmem>>, vector<1x8xf32>
    tpu.vector_store %arg3[%c0_14, %c0_15], %29 {strides = array<i32>} : memref<1x8xf32, #tpu.memory_space<vmem>>, vector<1x8xf32>,
    return
  }
}

module attributes {stable_mosaic.version = 11 : i64} {
  func.func @_conv_matmul_kernel(%arg0: i32, %arg1: i32, %arg2: memref<1x1xf32, #tpu.memory_space<smem>>, %arg3: memref<8x128xf32, #tpu.memory_space<vmem>>, %arg4: memref<8x1xf32, #tpu.memory_space<vmem>>, %arg5: memref<128x256xf32, #tpu.memory_space<vmem>>, %arg6: memref<8x256xf32, #tpu.memory_space<vmem>>, %arg7: memref<8x256xf32, #tpu.memory_space<vmem>>) attributes {dimension_semantics = [#tpu.dimension_semantics<parallel>, #tpu.dimension_semantics<arbitrary>], iteration_bounds = array<i64: 2, 1>, scalar_prefetch = 0 : i64, scratch_operands = 1 : i64, tpu.core_type = #tpu.core_type<tc>, window_params = [{transform_indices = @transform_0, window_bounds = array<i64: 1, 1>}, {transform_indices = @transform_1, window_bounds = array<i64: 8, 128>}, {pipeline_mode = #tpu.pipeline_mode<synchronous>, transform_indices = @transform_2, window_bounds = array<i64: 8, 1>}, {transform_indices = @transform_3, window_bounds = array<i64: 128, 256>}, {transform_indices = @transform_4, window_bounds = array<i64: 8, 256>}]} {
    %c0_i32 = arith.constant 0 : i32
    %0 = arith.cmpi eq, %arg1, %c0_i32 : i32
    %1 = arith.extui %0 : i1 to i32
    %c0_i32_0 = arith.constant 0 : i32
    %2 = arith.cmpi ne, %1, %c0_i32_0 : i32
    scf.if %2 {
      %cst_10 = arith.constant 0.000000e+00 : f32
      %12 = vector.broadcast %cst_10 : f32 to vector<8x256xf32>
      %c0_11 = arith.constant 0 : index
      %c0_12 = arith.constant 0 : index
      %13 = vector.load %arg7[%c0_11, %c0_12] : memref<8x256xf32, #tpu.memory_space<vmem>>, vector<8x256xf32>
      tpu.vector_store %arg7[%c0_11, %c0_12], %12 {strides = array<i32>} : memref<8x256xf32, #tpu.memory_space<vmem>>, vector<8x256xf32>,
    } else {
    }
    %c0 = arith.constant 0 : index
    %c0_1 = arith.constant 0 : index
    %3 = vector.load %arg7[%c0, %c0_1] : memref<8x256xf32, #tpu.memory_space<vmem>>, vector<8x256xf32>
    %c0_2 = arith.constant 0 : index
    %c0_3 = arith.constant 0 : index
    %4 = vector.load %arg3[%c0_2, %c0_3] : memref<8x128xf32, #tpu.memory_space<vmem>>, vector<8x128xf32>
    %c0_4 = arith.constant 0 : index
    %c0_5 = arith.constant 0 : index
    %5 = vector.load %arg5[%c0_4, %c0_5] : memref<128x256xf32, #tpu.memory_space<vmem>>, vector<128x256xf32>
    %cst = arith.constant dense<0.000000e+00> : vector<8x256xf32>
    %6 = tpu.matmul %4, %5, %cst {dimension_numbers = #tpu.dot_dimension_numbers<[1], [0], [0], [1], [0, 0, 1, 1], [], []>} : vector<8x128xf32>, vector<128x256xf32>, vector<8x256xf32> -> vector<8x256xf32>
    %7 = arith.addf %3, %6 : vector<8x256xf32>
    %c0_6 = arith.constant 0 : index
    %c0_7 = arith.constant 0 : index
    %8 = vector.load %arg7[%c0_6, %c0_7] : memref<8x256xf32, #tpu.memory_space<vmem>>, vector<8x256xf32>
    tpu.vector_store %arg7[%c0_6, %c0_7], %7 {strides = array<i32>} : memref<8x256xf32, #tpu.memory_space<vmem>>, vector<8x256xf32>,
    %c0_i32_8 = arith.constant 0 : i32
    %9 = arith.cmpi eq, %arg1, %c0_i32_8 : i32
    %10 = arith.extui %9 : i1 to i32
    %c0_i32_9 = arith.constant 0 : i32
    %11 = arith.cmpi ne, %10, %c0_i32_9 : i32
    scf.if %11 {
      %c0_10 = arith.constant 0 : index
      %c0_11 = arith.constant 0 : index
      %12 = memref.load %arg2[%c0_10, %c0_11] : memref<1x1xf32, #tpu.memory_space<smem>>
      %c0_12 = arith.constant 0 : index
      %c0_13 = arith.constant 0 : index
      %13 = vector.load %arg7[%c0_12, %c0_13] : memref<8x256xf32, #tpu.memory_space<vmem>>, vector<8x256xf32>
      %14 = vector.broadcast %12 : f32 to vector<8x256xf32>
      %15 = arith.mulf %13, %14 : vector<8x256xf32>
      %c0_14 = arith.constant 0 : index
      %c0_15 = arith.constant 0 : index
      %16 = vector.load %arg4[%c0_14, %c0_15] : memref<8x1xf32, #tpu.memory_space<vmem>>, vector<8x1xf32>
      %17 = vector.broadcast %16 : vector<8x1xf32> to vector<8x256xf32>
      %18 = arith.addf %15, %17 : vector<8x256xf32>
      %c0_16 = arith.constant 0 : index
      %c0_17 = arith.constant 0 : index
      %19 = vector.load %arg6[%c0_16, %c0_17] : memref<8x256xf32, #tpu.memory_space<vmem>>, vector<8x256xf32>
      tpu.vector_store %arg6[%c0_16, %c0_17], %18 {strides = array<i32>} : memref<8x256xf32, #tpu.memory_space<vmem>>, vector<8x256xf32>,
    } else {
    }
    return
  }
  func.func @transform_0(%arg0: i32, %arg1: i32) -> (i32, i32) {
    %c0_i32 = arith.constant 0 : i32
    %c0_i32_0 = arith.constant 0 : i32
    %c0_i32_1 = arith.constant 0 : i32
    return %c0_i32, %c0_i32_0 : i32, i32
  }
  func.func @transform_1(%arg0: i32, %arg1: i32) -> (i32, i32) {
    %c0_i32 = arith.constant 0 : i32
    %c0_i32_0 = arith.constant 0 : i32
    return %c0_i32, %arg1 : i32, i32
  }
  func.func @transform_2(%arg0: i32, %arg1: i32) -> (i32, i32) {
    %c0_i32 = arith.constant 0 : i32
    %c0_i32_0 = arith.constant 0 : i32
    %c0_i32_1 = arith.constant 0 : i32
    return %c0_i32, %c0_i32_0 : i32, i32
  }
  func.func @transform_3(%arg0: i32, %arg1: i32) -> (i32, i32) {
    %c0_i32 = arith.constant 0 : i32
    return %arg1, %arg0 : i32, i32
  }
  func.func @transform_4(%arg0: i32, %arg1: i32) -> (i32, i32) {
    %c0_i32 = arith.constant 0 : i32
    %c0_i32_0 = arith.constant 0 : i32
    return %c0_i32, %arg0 : i32, i32
  }
}

</mosaic_0001>

<bundles_post_ra>
// kernel: spectral_norm_conv_forward.2
= control target key start
LH: loop header
LB: loop body
LE: loop exit
PB: predicated region body
PF: predicated region fallthrough
CT: control target
= control target key end

     0   :  { %9 = vsyncpa [#allocation3], 0  ;;  %vm17_vm0 = vcmask 64512   ;;  %s315_s0 = inlined_call_operand.vmem [shape: f32[8,128], index: 0, kind: input, shape index: {}]   ;;  %s316_s1 = inlined_call_operand.vmem [shape: f32[1,8], index: 1, kind: input, shape index: {}]   ;;  %s317_s2 = inlined_call_operand.hbm [shape: f32[1,1], index: 2, kind: output, shape index: {0}]   ;;  %s318_s3 = inlined_call_operand.hbm [shape: f32[1,8], index: 3, kind: output, shape index: {1}]  }
   0x1   :  { %v15_v0 = vld [vmem:[%s315_s0] sm:$0xff] }
   0x2   :  { %v16_v1 = vld [vmem:[%s316_s1] sm:$0x1] }
   0x3   :  { %10 = vsyncpa [#allocation5], 0  ;;  %36 = vmatpush.msra.mxu0 %v15_v0  ;;  %98 = vmatpush.xpose.msra.mxu1 %v15_v0  ;;  %vm42_vm1 = vcmask 1040384   ;;  %vm104_vm8 = vcmask 57344   ;;  %s278_s16 = smov [#allocation4]   ;;  %s193_s20 = sshll.u32 %s318_s3, 4  ;;  %s194_s20 = int_to_ptr.hbm [resolvable:$true] %s193_s20 }
   0x4   :  { %207 = vmatmul.msk.f32.vlgmr.msra.gmra.mxu0 %vm17_vm0, %v16_v1  ;;  %s191_s17 = sshll.u32 %s278_s16, 4  ;;  %s279_s3 = smov [#allocation2]   ;;  %s192_s17 = int_to_ptr.vmem [resolvable:$true] %s191_s17 }
   0x5   :  { %s180_s22 = sshll.u32 %s279_s3, 4  ;;  %s182_s25 = sshll.u32 %s317_s2, 4  ;;  %s181_s22 = int_to_ptr.vmem [resolvable:$true] %s180_s22  ;;  %s183_s25 = int_to_ptr.hbm [resolvable:$true] %s182_s25 }
  0x81   :  { %v38_v2 = vpop.f32.mrf.mxu0 }
  0x82   :  { %v41_v3 = vmul.f32 %v38_v2, %v38_v2 }
  0x84   :  { %v43_v4 = vsel %vm42_vm1, %v41_v3, 0.0 }
  0x85   :  { %44 = vadd.xlane.f32.xlu0 %v43_v4 }
  0xf8   :  { %v45_v5 = vpop.xlane.xlu0 %44 }
  0xf9   :  { %v46_v6 = vrot.slane %v45_v5, 4 }
  0xfb   :  { %v47_v7 = vadd.f32 %v46_v6, %v45_v5 }
  0xfd   :  { %v48_v8 = vrot.slane %v47_v7, 2 }
  0xff   :  { %v49_v9 = vadd.f32 %v48_v8, %v47_v7 }
 0x101   :  { %v50_v10 = vrot.slane %v49_v9, 1 }
 0x103   :  { %v51_v11 = vadd.f32 %v50_v10, %v49_v9 }
 0x105   :  { %208 = vpush %v51_v11 }
 0x136   :  { %s209_s0 = spop %208 }
 0x137   :  { %v53_v12 = vstv %s209_s0 }
 0x138   :  { %216 = vrsqrt.f32 %v53_v12  ;;  %vm61_vm2 = vcmp.eq.f32.partialorder %v53_v12, inf  ;;  %v64_v20 = vand.u32 2147483648, %v53_v12  ;;  %vm63_vm3 = vcmp.eq.f32.partialorder %v53_v12, 0.0 }
 0x13e   :  { %v217_v13 = vpop.eup %216 }
 0x13f   :  { %v55_v14 = vmul.f32 %v217_v13, %v53_v12 }
 0x141   :  { %v56_v15 = vmul.f32 %v217_v13, %v55_v14 }
 0x143   :  { %v57_v16 = vmul.f32 0.5, %v56_v15 }
 0x145   :  { %v58_v17 = vsub.f32 1.5, %v57_v16 }
 0x147   :  { %v59_v18 = vmul.f32 %v217_v13, %v58_v17 }
 0x149   :  { %v60_v19 = vmul.f32 %v59_v18, %v53_v12 }
 0x14b   :  { %v62_v21 = vsel %vm61_vm2, %v53_v12, %v60_v19  ;;  %vm172_vm2 = vcmask 0  }
 0x14c   :  { %v65_v22 = vsel %vm63_vm3, %v64_v20, %v62_v21 }
 0x14d   :  { %v66_v23 = vadd.f32 1e-12, %v65_v22 }
 0x14f   :  { %218 = vrcp.f32 %v66_v23  ;;  %v78_v27 = vand.u32 2147483648, %v66_v23  ;;  %v76_v29 = vand.u32 2147483647, %v66_v23  ;;  %vm72_vm5 = vweird.f32 %v66_v23 }
 0x151   :  { %v79_v31 = vor.u32 1.1754944e-38, %v78_v27  ;;  %vm77_vm7 = vcmp.eq.f32.partialorder %v76_v29, 8.507059e+37 }
 0x155   :  { %v219_v24 = vpop.eup %218 }
 0x156   :  { %v68_v25 = vmul.f32 %v219_v24, %v66_v23  ;;  %vm73_vm4 = vweird.f32 %v219_v24 }
 0x157   :  { %vm74_vm6 = vmor %vm72_vm5, %vm73_vm4 }
 0x158   :  { %v69_v26 = vsub.f32 1.0, %v68_v25 }
 0x15a   :  { %v70_v28 = vmul.f32 %v219_v24, %v69_v26 }
 0x15c   :  { %v71_v30 = vadd.f32 %v219_v24, %v70_v28 }
 0x15e   :  { %v75_v32 = vsel %vm74_vm6, %v219_v24, %v71_v30 }
 0x15f   :  { %v80_v33 = vsel %vm77_vm7, %v79_v31, %v75_v32 }
 0x160   :  { %v82_v34 = vmul.f32 %v80_v33, %v38_v2 }
 0x162   :  { %99 = vmatmul.f32.vlgmr.msra.gmra.mxu1 %v82_v34 }
 0x1df   :  { %v100_v35 = vpop.f32.mrf.mxu1 }
 0x1e0   :  { %v103_v36 = vmul.f32 %v100_v35, %v100_v35 }
 0x1e2   :  { %v105_v37 = vsel %vm104_vm8, %v103_v36, 0.0 }
 0x1e3   :  { %106 = vadd.xlane.f32.xlu0 %v105_v37 }
 0x256   :  { %v107_v38 = vpop.xlane.xlu0 %106 }
 0x257   :  { %v108_v39 = vrot.slane %v107_v38, 4 }
 0x259   :  { %v109_v40 = vadd.f32 %v108_v39, %v107_v38 }
 0x25b   :  { %v110_v41 = vrot.slane %v109_v40, 2 }
 0x25d   :  { %v111_v42 = vadd.f32 %v110_v41, %v109_v40 }
 0x25f   :  { %v112_v43 = vrot.slane %v111_v42, 1 }
 0x261   :  { %v113_v44 = vadd.f32 %v112_v43, %v111_v42 }
 0x263   :  { %210 = vpush %v113_v44 }
 0x294   :  { %s211_s1 = spop %210 }
 0x295   :  { %v115_v45 = vstv %s211_s1 }
 0x296   :  { %220 = vrsqrt.f32 %v115_v45  ;;  %vm123_vm9 = vcmp.eq.f32.partialorder %v115_v45, inf  ;;  %v126_v53 = vand.u32 2147483648, %v115_v45  ;;  %vm125_vm10 = vcmp.eq.f32.partialorder %v115_v45, 0.0 }
 0x29c   :  { %v221_v46 = vpop.eup %220 }
 0x29d   :  { %v117_v47 = vmul.f32 %v221_v46, %v115_v45 }
 0x29f   :  { %v118_v48 = vmul.f32 %v221_v46, %v117_v47 }
 0x2a1   :  { %v119_v49 = vmul.f32 0.5, %v118_v48 }
 0x2a3   :  { %v120_v50 = vsub.f32 1.5, %v119_v49 }
 0x2a5   :  { %v121_v51 = vmul.f32 %v221_v46, %v120_v50 }
 0x2a7   :  { %v122_v52 = vmul.f32 %v121_v51, %v115_v45 }
 0x2a9   :  { %v124_v54 = vsel %vm123_vm9, %v115_v45, %v122_v52 }
 0x2aa   :  { %v127_v55 = vsel %vm125_vm10, %v126_v53, %v124_v54 }
 0x2ab   :  { %v128_v56 = vadd.f32 1e-12, %v127_v55 }
 0x2ad   :  { %222 = vrcp.f32 %v128_v56  ;;  %v140_v60 = vand.u32 2147483648, %v128_v56  ;;  %v138_v62 = vand.u32 2147483647, %v128_v56  ;;  %vm134_vm12 = vweird.f32 %v128_v56 }
 0x2af   :  { %v141_v0 = vor.u32 1.1754944e-38, %v140_v60  ;;  %vm139_vm14 = vcmp.eq.f32.partialorder %v138_v62, 8.507059e+37 }
 0x2b3   :  { %v223_v57 = vpop.eup %222 }
 0x2b4   :  { %v130_v58 = vmul.f32 %v223_v57, %v128_v56  ;;  %vm135_vm11 = vweird.f32 %v223_v57 }
 0x2b5   :  { %vm136_vm13 = vmor %vm134_vm12, %vm135_vm11 }
 0x2b6   :  { %v131_v59 = vsub.f32 1.0, %v130_v58 }
 0x2b8   :  { %v132_v61 = vmul.f32 %v223_v57, %v131_v59 }
 0x2ba   :  { %v133_v63 = vadd.f32 %v223_v57, %v132_v61 }
 0x2bc   :  { %v137_v1 = vsel %vm136_vm13, %v223_v57, %v133_v63 }
 0x2bd   :  { %v142_v2 = vsel %vm139_vm14, %v141_v0, %v137_v1 }
 0x2be   :  { %v144_v3 = vmul.f32 %v142_v2, %v100_v35 }
 0x2c0   :  { %v145_v4 = vmul.f32 %v144_v3, %v100_v35  ;;  %174 = vst.msk [vmem:[#allocation4] sm:$0x1] %vm104_vm8, %v144_v3 }
 0x2c1   :  { %196 = dma.vmem_to_hbm [thread:$0]  %s192_s17, 16, %s194_s20, [#allocation5]  }
 0x2c2   :  { %v146_v5 = vsel %vm104_vm8, %v145_v4, 0.0 }
 0x2c3   :  { %147 = vadd.xlane.f32.xlu1 %v146_v5 }
 0x336   :  { %v148_v6 = vpop.xlane.xlu1 %147 }
 0x337   :  { %v149_v7 = vrot.slane %v148_v6, 4 }
 0x339   :  { %v150_v8 = vadd.f32 %v149_v7, %v148_v6 }
 0x33b   :  { %v151_v9 = vrot.slane %v150_v8, 2 }
 0x33d   :  { %v152_v10 = vadd.f32 %v151_v9, %v150_v8 }
 0x33f   :  { %v153_v11 = vrot.slane %v152_v10, 1 }
 0x341   :  { %v154_v12 = vadd.f32 %v153_v11, %v152_v10 }
 0x343   :  { %212 = vpush %v154_v12 }
 0x374   :  { %s213_s21 = spop %212 }
 0x375   :  { %v156_v13 = vstv %s213_s21 }
 0x376   :  { %224 = vrcp.f32 %v156_v13  ;;  %v168_v17 = vand.u32 2147483648, %v156_v13  ;;  %v166_v19 = vand.u32 2147483647, %v156_v13  ;;  %vm162_vm0 = vweird.f32 %v156_v13 }
 0x378   :  { %v169_v21 = vor.u32 1.1754944e-38, %v168_v17  ;;  %vm167_vm3 = vcmp.eq.f32.partialorder %v166_v19, 8.507059e+37 }
 0x37c   :  { %v225_v14 = vpop.eup %224 }
 0x37d   :  { %v158_v15 = vmul.f32 %v225_v14, %v156_v13  ;;  %vm163_vm15 = vweird.f32 %v225_v14 }
 0x37e   :  { %vm164_vm1 = vmor %vm162_vm0, %vm163_vm15 }
 0x37f   :  { %v159_v16 = vsub.f32 1.0, %v158_v15 }
 0x381   :  { %v160_v18 = vmul.f32 %v225_v14, %v159_v16 }
 0x383   :  { %v161_v20 = vadd.f32 %v225_v14, %v160_v18 }
 0x385   :  { %v165_v22 = vsel %vm164_vm1, %v225_v14, %v161_v20 }
 0x386   :  { %v170_v23 = vsel %vm167_vm3, %v169_v21, %v165_v22 }
 0x387   :  { %173 = vst.msk [vmem:[#allocation2] sm:$0x1] %vm172_vm2, %v170_v23 }
 0x388   :  { %185 = dma.vmem_to_hbm [thread:$0]  %s181_s22, 16, %s183_s25, [#allocation3]  }
 0x389   :  { %274 = dma.done.wait [#allocation3], 16  }
 0x38a   :  { %275 = vsyncadd [#allocation3], 4294967280 }
 0x38b   :  { %276 = dma.done.wait [#allocation5], 16  }
 0x38c   :  { %277 = vsyncadd [#allocation5], 4294967280 }
 0x38d   :  { %205 = vsyncpa [#allocation3], 1 }
 0x38e   :  { %206 = vsyncpa [#allocation5], 1 }

// kernel: spectral_norm_conv_forward.3
= control target key start
LH: loop header
LB: loop body
LE: loop exit
PB: predicated region body
PF: predicated region fallthrough
CT: control target
= control target key end

     0   :  { %s810_s0 = inlined_call_operand.<no memory space> [shape: f32[1,1], index: 0, kind: input, shape index: {}]   ;;  %s811_s1 = inlined_call_operand.vmem [shape: f32[8,128], index: 1, kind: input, shape index: {}]   ;;  %s812_s2 = inlined_call_operand.vmem [shape: f32[8,1], index: 2, kind: input, shape index: {}]   ;;  %s813_s3 = inlined_call_operand.vmem [shape: f32[128,512], index: 3, kind: input, shape index: {}]   ;;  %s814_s4 = inlined_call_operand.vmem [shape: f32[8,512], index: 4, kind: output, shape index: {}]  }
   0x1   :  { %9 = sst [smem:[#allocation3]] %s810_s0 }
   0x2   :  { %s637_s17 = smov 0   ;;  %s639_s18 = smov 0  }
   0x3   :  { %s641_s19 = smov 0   ;;  %s643_s20 = smov 0  }
   0x4   :  { %s645_s21 = smov 0  }
   0x5 LB: > { %s27_s0 = sadd.s32 1, %s602_s20  ;;  %p111_p1 = scmp.ne.s32.totalorder %s594_s18, %s590_s17  ;;  %s606_s21 = sphi %s645_s21, %s15_s21   ;;  %s602_s20 = sphi %s643_s20, %s818_s20   ;;  %s598_s19 = sphi %s641_s19, %s817_s19   ;;  %s594_s18 = sphi %s639_s18, %s816_s18   ;;  %s590_s17 = sphi %s637_s17, %s815_s17  }
   0x6   : > { %p29_p0 = scmp.ge.s32.totalorder %s27_s0, 2  ;;  %p112_p2 = scmp.eq.s32.totalorder %s606_s21, 0 }
   0x7   : > { %s104_s23 = sadd.s32 1, %s594_s18  ;;  %p515_p5 = scmp.ge.s32.totalorder %s606_s21, 2 }
   0x8   : > { %s820_s0 = smov (%p29_p0, %s27_s0), 0  ;;  %p113_p3 = por %p112_p2, %p111_p1 }
   0x9   : > { %s100_s22 = ssub.s32 %s602_s20, %s820_s0  ;;  %176 = sbr.rel (%p515_p5) target bundleno = 50 (0x32), region = 28 }
   0xa   : > { %p102_p4 = scmp.eq.s32.totalorder %s100_s22, 0 }
   0xc   : > { %s672_s24 = scalar_select %p102_p4, %s594_s18, %s104_s23  }
   0xe   : > { %179 = sbr.rel (!%p113_p3) target bundleno = 50 (0x32), region = 32  ;;  %s181_s25 = sand.u32 (%p113_p3), 1, %s594_s18  }
   0xf   : > { %s525_s26 = sshll.u32 (%p113_p3), %s602_s20, 4  ;;  %s516_s27 = sshll.u32 (%p113_p3), %s181_s25, 8 }
  0x10   : > { %s680_s30 = scalar_lea.vmem (%p113_p3), %s813_s3, %s525_s26  ;;  %s685_s5 = scalar_lea.vmem (%p113_p3), [#allocation4], %s516_s27 }
  0x11   : > { %v202_v0 = vld [vmem:[%s680_s30] sm:$0xff] (%p113_p3)  ;;  %v204_v1 = vld [vmem:[%s680_s30 + $0x8] sm:$0xff] (%p113_p3) }
  0x12   : > { %v206_v2 = vld [vmem:[%s680_s30 + $0x20] sm:$0xff] (%p113_p3)  ;;  %203 = vst [vmem:[%s685_s5] sm:$0xff] (%p113_p3), %v202_v0  ;;  %v208_v3 = vld [vmem:[%s680_s30 + $0x28] sm:$0xff] (%p113_p3) }
  0x13   : > { %205 = vst [vmem:[%s685_s5 + $0x8] sm:$0xff] %v204_v1  ;;  %v210_v4 = vld [vmem:[%s680_s30 + $0x40] sm:$0xff]  ;;  %v212_v5 = vld [vmem:[%s680_s30 + $0x48] sm:$0xff] }
  0x14   : > { %207 = vst [vmem:[%s685_s5 + $0x10] sm:$0xff] %v206_v2  ;;  %v214_v6 = vld [vmem:[%s680_s30 + $0x60] sm:$0xff]  ;;  %v216_v7 = vld [vmem:[%s680_s30 + $0x68] sm:$0xff] }
  0x15   : > { %209 = vst [vmem:[%s685_s5 + $0x18] sm:$0xff] %v208_v3  ;;  %v218_v8 = vld [vmem:[%s680_s30 + $0x80] sm:$0xff]  ;;  %v220_v9 = vld [vmem:[%s680_s30 + $0x88] sm:$0xff] }
  0x16   : > { %211 = vst [vmem:[%s685_s5 + $0x20] sm:$0xff] %v210_v4  ;;  %v222_v10 = vld [vmem:[%s680_s30 + $0xa0] sm:$0xff]  ;;  %v224_v11 = vld [vmem:[%s680_s30 + $0xa8] sm:$0xff] }
  0x17   : > { %213 = vst [vmem:[%s685_s5 + $0x28] sm:$0xff] %v212_v5  ;;  %v226_v12 = vld [vmem:[%s680_s30 + $0xc0] sm:$0xff]  ;;  %v228_v13 = vld [vmem:[%s680_s30 + $0xc8] sm:$0xff] }
  0x18   : > { %215 = vst [vmem:[%s685_s5 + $0x30] sm:$0xff] %v214_v6  ;;  %v230_v14 = vld [vmem:[%s680_s30 + $0xe0] sm:$0xff]  ;;  %v232_v15 = vld [vmem:[%s680_s30 + $0xe8] sm:$0xff] }
  0x19   : > { %217 = vst [vmem:[%s685_s5 + $0x38] sm:$0xff] %v216_v7  ;;  %v234_v16 = vld [vmem:[%s680_s30 + $0x100] sm:$0xff]  ;;  %v236_v17 = vld [vmem:[%s680_s30 + $0x108] sm:$0xff] }
  0x1a   : > { %219 = vst [vmem:[%s685_s5 + $0x40] sm:$0xff] %v218_v8  ;;  %v238_v18 = vld [vmem:[%s680_s30 + $0x120] sm:$0xff]  ;;  %v240_v19 = vld [vmem:[%s680_s30 + $0x128] sm:$0xff] }
  0x1b   : > { %221 = vst [vmem:[%s685_s5 + $0x48] sm:$0xff] %v220_v9  ;;  %v242_v20 = vld [vmem:[%s680_s30 + $0x140] sm:$0xff]  ;;  %v244_v21 = vld [vmem:[%s680_s30 + $0x148] sm:$0xff] }
  0x1c   : > { %223 = vst [vmem:[%s685_s5 + $0x50] sm:$0xff] %v222_v10  ;;  %v246_v22 = vld [vmem:[%s680_s30 + $0x160] sm:$0xff]  ;;  %v248_v23 = vld [vmem:[%s680_s30 + $0x168] sm:$0xff] }
  0x1d   : > { %225 = vst [vmem:[%s685_s5 + $0x58] sm:$0xff] %v224_v11  ;;  %v250_v24 = vld [vmem:[%s680_s30 + $0x180] sm:$0xff]  ;;  %v252_v25 = vld [vmem:[%s680_s30 + $0x188] sm:$0xff] }
  0x1e   : > { %227 = vst [vmem:[%s685_s5 + $0x60] sm:$0xff] %v226_v12  ;;  %v254_v26 = vld [vmem:[%s680_s30 + $0x1a0] sm:$0xff]  ;;  %v256_v27 = vld [vmem:[%s680_s30 + $0x1a8] sm:$0xff] }
  0x1f   : > { %229 = vst [vmem:[%s685_s5 + $0x68] sm:$0xff] %v228_v13  ;;  %v258_v28 = vld [vmem:[%s680_s30 + $0x1c0] sm:$0xff]  ;;  %v260_v29 = vld [vmem:[%s680_s30 + $0x1c8] sm:$0xff] }
  0x20   : > { %231 = vst [vmem:[%s685_s5 + $0x70] sm:$0xff] %v230_v14  ;;  %v262_v30 = vld [vmem:[%s680_s30 + $0x1e0] sm:$0xff]  ;;  %v264_v31 = vld [vmem:[%s680_s30 + $0x1e8] sm:$0xff] }
  0x21   : > { %233 = vst [vmem:[%s685_s5 + $0x78] sm:$0xff] %v232_v15 }
  0x22   : > { %235 = vst [vmem:[%s685_s5 + $0x80] sm:$0xff] %v234_v16 }
  0x23   : > { %237 = vst [vmem:[%s685_s5 + $0x88] sm:$0xff] %v236_v17 }
  0x24   : > { %239 = vst [vmem:[%s685_s5 + $0x90] sm:$0xff] %v238_v18 }
  0x25   : > { %241 = vst [vmem:[%s685_s5 + $0x98] sm:$0xff] %v240_v19 }
  0x26   : > { %243 = vst [vmem:[%s685_s5 + $0xa0] sm:$0xff] %v242_v20 }
  0x27   : > { %245 = vst [vmem:[%s685_s5 + $0xa8] sm:$0xff] %v244_v21 }
  0x28   : > { %247 = vst [vmem:[%s685_s5 + $0xb0] sm:$0xff] %v246_v22 }
  0x29   : > { %249 = vst [vmem:[%s685_s5 + $0xb8] sm:$0xff] %v248_v23 }
  0x2a   : > { %251 = vst [vmem:[%s685_s5 + $0xc0] sm:$0xff] %v250_v24 }
  0x2b   : > { %253 = vst [vmem:[%s685_s5 + $0xc8] sm:$0xff] %v252_v25 }
  0x2c   : > { %255 = vst [vmem:[%s685_s5 + $0xd0] sm:$0xff] %v254_v26 }
  0x2d   : > { %257 = vst [vmem:[%s685_s5 + $0xd8] sm:$0xff] %v256_v27 }
  0x2e   : > { %259 = vst [vmem:[%s685_s5 + $0xe0] sm:$0xff] %v258_v28 }
  0x2f   : > { %261 = vst [vmem:[%s685_s5 + $0xe8] sm:$0xff] %v260_v29 }
  0x30   : > { %263 = vst [vmem:[%s685_s5 + $0xf0] sm:$0xff] %v262_v30 }
  0x31   : > { %265 = vst [vmem:[%s685_s5 + $0xf8] sm:$0xff] %v264_v31 }
  0x32 PF: > { %p519_p6 = scmp.ge.s32.totalorder %s606_s21, 1  ;;  %p270_p7 = scmp.lt.s32.totalorder %s606_s21, 3 }
  0x34   : > { %p271_p8 = pnand %p519_p6, %p270_p7 }
  0x35   : > { %s277_s6 = sand.u32 (!%p271_p8), 1, %s590_s17   ;;  %s521_s13 = sshll.u32 (!%p271_p8), %s598_s19, 1 }
  0x36   : > { %274 = sbr.rel (%p271_p8) target bundleno = 223 (0xdf), region = 55  ;;  %s520_s7 = sshll.u32 (!%p271_p8), %s277_s6, 8 }
  0x37   : > { %s751_s8 = scalar_lea.vmem (!%p271_p8), [#allocation4], %s520_s7  ;;  %s406_s14 = sld [smem:[#allocation3]] (!%p271_p8) }
  0x38   : > { %p313_p9 = scmp.lt.s32.totalorder (!%p271_p8), %s521_s13, 3 }
  0x3b   : > { %v357_v32 = vld [vmem:[%s751_s8 + $0xf0] sm:$0xff]  ;;  %v358_v33 = vld [vmem:[%s751_s8 + $0xf8] sm:$0xff]  ;;  %v355_v34 = vld [vmem:[%s751_s8 + $0xe0] sm:$0xff]  ;;  %v608_v38 = vmov 0   ;;  %s822_s13 = smov (!%p313_p9, %s521_s13), 3 }
  0x3c   : > { %359 = vmatpush.msra.mxu0 %v357_v32  ;;  %379 = vmatpush.msra.mxu1 %v358_v33  ;;  %v356_v35 = vld [vmem:[%s751_s8 + $0xe8] sm:$0xff]  ;;  %v353_v36 = vld [vmem:[%s751_s8 + $0xd0] sm:$0xff]  ;;  %v354_v37 = vld [vmem:[%s751_s8 + $0xd8] sm:$0xff]  ;;  %s522_s15 = sshll.u32 %s822_s13, 3 }
  0x3d   : > { %567 = vset.pattern.permute.xlu0 %v608_v38  ;;  %v351_v39 = vld [vmem:[%s751_s8 + $0xc0] sm:$0xff]  ;;  %v352_v40 = vld [vmem:[%s751_s8 + $0xc8] sm:$0xff]  ;;  %v349_v41 = vld [vmem:[%s751_s8 + $0xb0] sm:$0xff]  ;;  %v409_v3 = vstv %s406_s14  ;;  %s316_s22 = scalar_lea.vmem %s814_s4, %s522_s15 }
  0x3e   : > { %360 = vmatpush.msra.mxu0 %v355_v34  ;;  %380 = vmatpush.msra.mxu1 %v356_v35  ;;  %v350_v42 = vld [vmem:[%s751_s8 + $0xb8] sm:$0xff]  ;;  %v347_v43 = vld [vmem:[%s751_s8 + $0xa0] sm:$0xff]  ;;  %v348_v44 = vld [vmem:[%s751_s8 + $0xa8] sm:$0xff] }
  0x3f   : > { %v345_v45 = vld [vmem:[%s751_s8 + $0x90] sm:$0xff]  ;;  %v346_v46 = vld [vmem:[%s751_s8 + $0x98] sm:$0xff]  ;;  %v412_v47 = vld [vmem:[%s812_s2] sm:$0xff] }
  0x40   : > { %361 = vmatpush.msra.mxu0 %v353_v36  ;;  %381 = vmatpush.msra.mxu1 %v354_v37  ;;  %v343_v48 = vld [vmem:[%s751_s8 + $0x80] sm:$0xff]  ;;  %v344_v49 = vld [vmem:[%s751_s8 + $0x88] sm:$0xff]  ;;  %v341_v50 = vld [vmem:[%s751_s8 + $0x70] sm:$0xff] }
  0x41   : > { %415 = vperm.xlu0 %567, %v412_v47   ;;  %v342_v51 = vld [vmem:[%s751_s8 + $0x78] sm:$0xff]  ;;  %v339_v52 = vld [vmem:[%s751_s8 + $0x60] sm:$0xff]  ;;  %v340_v53 = vld [vmem:[%s751_s8 + $0x68] sm:$0xff] }
  0x42   : > { %362 = vmatpush.msra.mxu0 %v351_v39  ;;  %382 = vmatpush.msra.mxu1 %v352_v40  ;;  %v337_v54 = vld [vmem:[%s751_s8 + $0x50] sm:$0xff]  ;;  %v338_v55 = vld [vmem:[%s751_s8 + $0x58] sm:$0xff]  ;;  %v335_v56 = vld [vmem:[%s751_s8 + $0x40] sm:$0xff] }
  0x43   : > { %v336_v57 = vld [vmem:[%s751_s8 + $0x48] sm:$0xff]  ;;  %v333_v58 = vld [vmem:[%s751_s8 + $0x30] sm:$0xff]  ;;  %v334_v59 = vld [vmem:[%s751_s8 + $0x38] sm:$0xff] }
  0x44   : > { %363 = vmatpush.msra.mxu0 %v349_v41  ;;  %383 = vmatpush.msra.mxu1 %v350_v42  ;;  %v331_v60 = vld [vmem:[%s751_s8 + $0x20] sm:$0xff]  ;;  %v332_v61 = vld [vmem:[%s751_s8 + $0x28] sm:$0xff]  ;;  %v329_v62 = vld [vmem:[%s751_s8 + $0x10] sm:$0xff] }
  0x45   : > { %v330_v63 = vld [vmem:[%s751_s8 + $0x18] sm:$0xff]  ;;  %v327_v0 = vld [vmem:[%s751_s8] sm:$0xff]  ;;  %v328_v1 = vld [vmem:[%s751_s8 + $0x8] sm:$0xff] }
  0x46   : > { %364 = vmatpush.msra.mxu0 %v347_v43  ;;  %384 = vmatpush.msra.mxu1 %v348_v44  ;;  %v326_v2 = vld [vmem:[%s811_s1] sm:$0xff] }
  0x48   : > { %365 = vmatpush.msra.mxu0 %v345_v45  ;;  %385 = vmatpush.msra.mxu1 %v346_v46 }
  0x4a   : > { %366 = vmatpush.msra.mxu0 %v343_v48  ;;  %386 = vmatpush.msra.mxu1 %v344_v49 }
  0x4c   : > { %367 = vmatpush.msra.mxu0 %v341_v50  ;;  %387 = vmatpush.msra.mxu1 %v342_v51 }
  0x4e   : > { %368 = vmatpush.msra.mxu0 %v339_v52  ;;  %388 = vmatpush.msra.mxu1 %v340_v53 }
  0x50   : > { %369 = vmatpush.msra.mxu0 %v337_v54  ;;  %389 = vmatpush.msra.mxu1 %v338_v55 }
  0x52   : > { %370 = vmatpush.msra.mxu0 %v335_v56  ;;  %390 = vmatpush.msra.mxu1 %v336_v57 }
  0x54   : > { %371 = vmatpush.msra.mxu0 %v333_v58  ;;  %391 = vmatpush.msra.mxu1 %v334_v59 }
  0x56   : > { %372 = vmatpush.msra.mxu0 %v331_v60  ;;  %392 = vmatpush.msra.mxu1 %v332_v61 }
  0x58   : > { %373 = vmatpush.msra.mxu0 %v329_v62  ;;  %393 = vmatpush.msra.mxu1 %v330_v63 }
  0x5a   : > { %374 = vmatpush.msra.mxu0 %v327_v0  ;;  %394 = vmatpush.msra.mxu1 %v328_v1 }
  0x5b   : > { %375 = vmatmul.f32.vlgmr.msra.gmra.mxu0 %v326_v2  ;;  %395 = vmatmul.f32.vlgmr.msra.gmra.mxu1 %v326_v2 }
  0xb3   : > { %v416_v4 = vpop.permute.xlu0 %415 }
  0xd8   : > { %v376_v5 = vpop.f32.mrf.mxu0  ;;  %v396_v6 = vpop.f32.mrf.mxu1 }
  0xd9   : > { %v410_v7 = vmul.f32 %v409_v3, %v376_v5  ;;  %v411_v8 = vmul.f32 %v409_v3, %v396_v6 }
  0xdb   : > { %v418_v9 = vadd.f32 %v416_v4, %v410_v7  ;;  %v419_v10 = vadd.f32 %v416_v4, %v411_v8 }
  0xdd   : > { %420 = vst [vmem:[%s316_s22] sm:$0xff] %v418_v9 }
  0xde   : > { %421 = vst [vmem:[%s316_s22 + $0x8] sm:$0xff] %v419_v10 }
  0xdf PF: > { %s15_s21 = sadd.s32 1, %s606_s21   ;;  %s815_s17 = smov %s594_s18 }
  0xe0   : > { %p12_p10 = scmp.ge.s32.totalorder %s15_s21, 4   ;;  %s816_s18 = smov %s672_s24 }
  0xe1   : > { %s817_s19 = smov %s602_s20  ;;  %s818_s20 = smov %s820_s0 }
  0xe2   :  { %14 = sbr.rel (!%p12_p10) target bundleno = 5 (0x5), region = 105 }

</bundles_post_ra>
